<compile_context>
chip_gen: v5e
topology: v5e:2x2
jax: 0.10.0
libtpu: 0.0.40
codegen_flags: <defaults>
</compile_context>

<pallas_src>
import jax
import jax.numpy as jnp
from jax.experimental import pallas as pl
from jax.experimental.pallas import tpu as pltpu


def _patch_embed_kernel(p_ref, w_ref, b_ref, o_ref):
    # p_ref: (1, K, TP)  bf16 patches tile (K = C*ps*ps contraction dim)
    # w_ref: (N, K)      bf16 weight, VMEM-resident across the whole grid
    # b_ref: (N, 1)      f32 bias,   VMEM-resident across the whole grid
    # o_ref: (1, N, TP)  output tile (lane-dense along TP), bf16 by default
    acc = jax.lax.dot_general(
        w_ref[...], p_ref[0],
        dimension_numbers=(((1,), (0,)), ((), ())),
        preferred_element_type=jnp.float32,
    )                                   # (N, TP) f32 MXU accumulation
    acc = acc + b_ref[...]              # f32 bias add, broadcast over lanes
    o_ref[0] = acc.astype(o_ref.dtype)


def _choose_tile_p(P, B, tile_p, min_total_steps=4):
    """Pick the lane-tile size over P (the patch-position axis)."""
    tile_p = max(128, (tile_p // 128) * 128)
    if P > tile_p:
        return tile_p                      # multiple of 128; big tiles
    # P fits in one tile: full-extent block is legal for any P and leaves no
    # ragged / masked last tile.  Only split when that would leave too few
    # grid steps to amortize the pipeline and keep both v7x TCs busy.
    if B >= min_total_steps or P <= 1024:
        return P
    steps = -(-min_total_steps // B)       # ceil
    per_step = -(-P // steps)              # ceil(P / steps)
    tp = -(-per_step // 128) * 128         # round up to a lane multiple
    return min(max(tp, 512), tile_p)


def patch_embed(x, weight, bias, patch_size, *, tile_p=4096,
                out_dtype=jnp.bfloat16):
    """x: (B, C, H, W). weight: (embed_dim, C, ps, ps). bias: (embed_dim,).

    Returns (B, embed_dim, H/ps, W/ps), matching nn.Conv2d(stride=ps) output
    (bf16 inputs to the MXU, f32 accumulation, `out_dtype` output).
    """
    B, C, H, W = x.shape
    ps = patch_size
    N = weight.shape[0]                  # embed_dim
    Hp, Wp = H // ps, W // ps
    P = Hp * Wp
    K = C * ps * ps

    # --- glue: single im2col pass, fused with the bf16 downcast --------------
    # (B,C,H,W) -> (B,C,Hp,ps,Wp,ps) -> (B, c,kh,kw, hp,wp) -> (B, K, P)
    # K flattened in (c, kh, kw) order to match weight.reshape(N, K).
    # If the producer already hands us bf16, the cast is a no-op and this pass
    # is half-width.
    x_bf16 = x if x.dtype == jnp.bfloat16 else x.astype(jnp.bfloat16)
    patches = x_bf16.reshape(B, C, Hp, ps, Wp, ps)
    patches = patches.transpose(0, 1, 3, 5, 2, 4).reshape(B, K, P)

    w_mat = weight.reshape(N, K).astype(jnp.bfloat16)   # (N, K): no transpose
    b_mat = bias.reshape(N, 1).astype(jnp.float32)
    out_itemsize = jnp.dtype(out_dtype).itemsize

    TP = _choose_tile_p(P, B, tile_p)
    grid = (B, pl.cdiv(P, TP))

    # Double-buffered in/out tiles + resident weight/bias, with 2x headroom;
    # floor at the tightest scoped default (16 MiB on v5e).  A few MB even at
    # TP=4096, so it also fits v7x's 64 MiB physical VMEM easily.
    tile_bytes = 2 * (K * TP * 2 + N * TP * out_itemsize)
    resident_bytes = N * K * 2 + N * 4
    vmem_limit = max(int(2 * (tile_bytes + resident_bytes)), 16 * 1024 * 1024)

    out = pl.pallas_call(
        _patch_embed_kernel,
        out_shape=jax.ShapeDtypeStruct((B, N, P), out_dtype),
        grid_spec=pltpu.PrefetchScalarGridSpec(
            num_scalar_prefetch=0,
            grid=grid,
            in_specs=[
                pl.BlockSpec((1, K, TP), lambda b, j: (b, 0, j)),   # patches tile
                pl.BlockSpec((N, K), lambda b, j: (0, 0)),          # weight (resident)
                pl.BlockSpec((N, 1), lambda b, j: (0, 0)),          # bias   (resident)
            ],
            out_specs=pl.BlockSpec((1, N, TP), lambda b, j: (b, 0, j)),
        ),
        compiler_params=pltpu.CompilerParams(
            dimension_semantics=("parallel", "parallel"),
            vmem_limit_bytes=vmem_limit,
        ),
        cost_estimate=pl.CostEstimate(
            flops=int(2 * B * P * K * N),
            transcendentals=0,
            bytes_accessed=int(
                B * K * P * 2 + N * K * 2 + N * 4 + B * N * P * out_itemsize
            ),
        ),
    )(patches, w_mat, b_mat)

    # Free reshape to NCHW -- no output transpose pass.
    return out.reshape(B, N, Hp, Wp)


def reference_patch_embed(x, weight, bias, patch_size):
    """Plain-JAX f32 reference of the strided conv for correctness check."""
    out = jax.lax.conv_general_dilated(
        x, weight,
        window_strides=(patch_size, patch_size),
        padding="VALID",
        dimension_numbers=("NCHW", "OIHW", "NCHW"),
    )
    return out + bias.reshape(1, -1, 1, 1)


if __name__ == "__main__":
    # Small shapes consistent with the module: img_size=16, patch_size=4,
    # in_chans=3 (module default), embed_dim=32, batch=2.
    B, C, ps, embed_dim = 2, 3, 4, 32
    H = W = 16

    key = jax.random.PRNGKey(0)
    kx, kw, kb = jax.random.split(key, 3)
    x = jax.random.normal(kx, (B, C, H, W), dtype=jnp.float32)
    # Deterministic synthetic Conv2d(in_chans, embed_dim, ps, ps) parameters.
    weight = jax.random.normal(kw, (embed_dim, C, ps, ps), dtype=jnp.float32) * 0.02
    bias = jax.random.normal(kb, (embed_dim,), dtype=jnp.float32) * 0.02

    out = jax.block_until_ready(patch_embed(x, weight, bias, ps))
    ref = jax.block_until_ready(reference_patch_embed(x, weight, bias, ps))

    assert out.shape == (B, embed_dim, H // ps, W // ps), out.shape
    assert out.dtype == jnp.bfloat16, out.dtype
    # bf16 inputs to the MXU (f32 accumulation) + bf16 output -> loosened
    # tolerance vs the f32 conv reference.
    out_f32 = out.astype(jnp.float32)
    assert jnp.allclose(out_f32, ref, atol=2e-2, rtol=2e-2), float(
        jnp.max(jnp.abs(out_f32 - ref))
    )

    # Non-square spatial extent (Hp != Wp): guards the (c,kh,kw)/(hp,wp)
    # flattening order.  Also exercises the f32-output path.
    H2, W2 = 16, 32
    x2 = jax.random.normal(kx, (B, C, H2, W2), dtype=jnp.float32)
    out2 = jax.block_until_ready(
        patch_embed(x2, weight, bias, ps, out_dtype=jnp.float32)
    )
    ref2 = jax.block_until_ready(reference_patch_embed(x2, weight, bias, ps))
    assert out2.shape == (B, embed_dim, H2 // ps, W2 // ps), out2.shape
    assert jnp.allclose(out2, ref2, atol=2e-2, rtol=2e-2), float(
        jnp.max(jnp.abs(out2 - ref2))
    )

    print("KERNEL_OK")
</pallas_src>

<mosaic_0001>
module attributes {stable_mosaic.version = 11 : i64} {
  func.func @_patch_embed_kernel(%arg0: i32, %arg1: i32, %arg2: memref<1x48x16xbf16, #tpu.memory_space<vmem>>, %arg3: memref<32x48xbf16, #tpu.memory_space<vmem>>, %arg4: memref<32x1xf32, #tpu.memory_space<vmem>>, %arg5: memref<1x32x16xbf16, #tpu.memory_space<vmem>>) attributes {dimension_semantics = [#tpu.dimension_semantics<parallel>, #tpu.dimension_semantics<parallel>], iteration_bounds = array<i64: 2, 1>, scalar_prefetch = 0 : i64, scratch_operands = 0 : i64, tpu.core_type = #tpu.core_type<tc>, window_params = [{transform_indices = @transform_0, window_bounds = array<i64: 1, 48, 16>}, {pipeline_mode = #tpu.pipeline_mode<synchronous>, transform_indices = @transform_1, window_bounds = array<i64: 32, 48>}, {pipeline_mode = #tpu.pipeline_mode<synchronous>, transform_indices = @transform_2, window_bounds = array<i64: 32, 1>}, {transform_indices = @transform_3, window_bounds = array<i64: 1, 32, 16>}]} {
    %c0 = arith.constant 0 : index
    %c0_0 = arith.constant 0 : index
    %0 = vector.load %arg3[%c0, %c0_0] : memref<32x48xbf16, #tpu.memory_space<vmem>>, vector<32x48xbf16>
    %c0_1 = arith.constant 0 : index
    %c0_2 = arith.constant 0 : index
    %c0_3 = arith.constant 0 : index
    %1 = vector.load %arg2[%c0_1, %c0_2, %c0_3] : memref<1x48x16xbf16, #tpu.memory_space<vmem>>, vector<1x48x16xbf16>
    %2 = vector.shape_cast %1 : vector<1x48x16xbf16> to vector<48x16xbf16>
    %cst = arith.constant dense<0.000000e+00> : vector<32x16xf32>
    %3 = tpu.matmul %0, %2, %cst {dimension_numbers = #tpu.dot_dimension_numbers<[1], [0], [0], [1], [0, 0, 1, 1], [], []>} : vector<32x48xbf16>, vector<48x16xbf16>, vector<32x16xf32> -> vector<32x16xf32>
    %c0_4 = arith.constant 0 : index
    %c0_5 = arith.constant 0 : index
    %4 = vector.load %arg4[%c0_4, %c0_5] : memref<32x1xf32, #tpu.memory_space<vmem>>, vector<32x1xf32>
    %5 = vector.broadcast %4 : vector<32x1xf32> to vector<32x16xf32>
    %6 = arith.addf %3, %5 : vector<32x16xf32>
    %7 = arith.truncf %6 : vector<32x16xf32> to vector<32x16xbf16>
    %c0_6 = arith.constant 0 : index
    %c0_7 = arith.constant 0 : index
    %c0_8 = arith.constant 0 : index
    %8 = vector.load %arg5[%c0_6, %c0_7, %c0_8] : memref<1x32x16xbf16, #tpu.memory_space<vmem>>, vector<1x32x16xbf16>
    %9 = vector.shape_cast %8 : vector<1x32x16xbf16> to vector<32x16xbf16>
    %10 = vector.shape_cast %7 : vector<32x16xbf16> to vector<1x32x16xbf16>
    tpu.vector_store %arg5[%c0_6, %c0_7, %c0_8], %10 {strides = array<i32>} : memref<1x32x16xbf16, #tpu.memory_space<vmem>>, vector<1x32x16xbf16>,
    return
  }
  func.func @transform_0(%arg0: i32, %arg1: i32) -> (i32, i32, i32) {
    %c0_i32 = arith.constant 0 : i32
    %c0_i32_0 = arith.constant 0 : i32
    return %arg0, %c0_i32, %arg1 : i32, i32, i32
  }
  func.func @transform_1(%arg0: i32, %arg1: i32) -> (i32, i32) {
    %c0_i32 = arith.constant 0 : i32
    %c0_i32_0 = arith.constant 0 : i32
    %c0_i32_1 = arith.constant 0 : i32
    return %c0_i32, %c0_i32_0 : i32, i32
  }
  func.func @transform_2(%arg0: i32, %arg1: i32) -> (i32, i32) {
    %c0_i32 = arith.constant 0 : i32
    %c0_i32_0 = arith.constant 0 : i32
    %c0_i32_1 = arith.constant 0 : i32
    return %c0_i32, %c0_i32_0 : i32, i32
  }
  func.func @transform_3(%arg0: i32, %arg1: i32) -> (i32, i32, i32) {
    %c0_i32 = arith.constant 0 : i32
    %c0_i32_0 = arith.constant 0 : i32
    return %arg0, %c0_i32, %arg1 : i32, i32, i32
  }
}

</mosaic_0001>

<bundles_post_ra>
// kernel: tpu_custom_call.1
= control target key start
LH: loop header
LB: loop body
LE: loop exit
PB: predicated region body
PF: predicated region fallthrough
CT: control target
= control target key end

     0   :  { %s497_s12 = smov 0   ;;  %s499_s13 = smov 0   ;;  %s552_s0 = inlined_call_operand.vmem [shape: bf16[2,48,16], index: 0, kind: input, shape index: {}]   ;;  %s553_s1 = inlined_call_operand.vmem [shape: bf16[32,48], index: 1, kind: input, shape index: {}]   ;;  %s554_s2 = inlined_call_operand.vmem [shape: f32[32,1], index: 2, kind: input, shape index: {}]   ;;  %s555_s3 = inlined_call_operand.vmem [shape: bf16[2,32,16], index: 3, kind: output, shape index: {}]  }
   0x1   :  { %s501_s14 = smov 0  }
   0x2 LB: > { %s25_s15 = sadd.s32 1, %s470_s13  ;;  %p387_p0 = scmp.ge.s32.totalorder %s474_s14, 1  ;;  %s474_s14 = sphi %s501_s14, %s13_s14   ;;  %s470_s13 = sphi %s499_s13, %s557_s13   ;;  %s466_s12 = sphi %s497_s12, %s556_s12  }
   0x3   : > { %p27_p1 = scmp.ge.s32.totalorder %s25_s15, 2  ;;  %p156_p2 = scmp.lt.s32.totalorder %s474_s14, 3 }
   0x5   : > { %s559_s15 = smov (%p27_p1, %s25_s15), 0  ;;  %p157_p3 = pnand %p387_p0, %p156_p2 }
   0x6   : > { %p186_p4 = scmp.lt.s32.totalorder (!%p157_p3), %s466_s12, 1 }
   0x7   : > { %160 = sbr.rel (%p157_p3) target bundleno = 168 (0xa8), region = 32 }
   0xc   : > { %v215_v0 = vld [vmem:[%s554_s2 + $0x10] sm:$0xff]  ;;  %v476_v1 = vmov 0   ;;  %v213_v2 = vld [vmem:[%s554_s2] sm:$0xff]  ;;  %s561_s12 = smov (!%p186_p4, %s466_s12), 1  ;;  %v216_v4 = vld [vmem:[%s554_s2 + $0x18] sm:$0xff]  ;;  %vm265_vm0 = vcmask 392192  }
   0xd   : > { %451 = vset.pattern.permute.xlu1 %v476_v1  ;;  %450 = vset.pattern.permute.xlu0 %v476_v1  ;;  %s424_s20 = smul.u32 24, %s561_s12  ;;  %v214_v5 = vld [vmem:[%s554_s2 + $0x8] sm:$0xff]  ;;  %v416_v8 = vld [vmem:[%s553_s1] sm:$0xff]  ;;  %s415_s5 = sshll.u32 %s561_s12, 4  ;;  %vm295_vm1 = vcmask 125952  }
   0xe   : > { %229 = vperm.xlu1 %451, %v215_v0   ;;  %219 = vperm.xlu0 %450, %v213_v2   ;;  %v417_v9 = vld [vmem:[%s553_s1 + $0x8] sm:$0xff]  ;;  %s201_s8 = scalar_lea.vmem %s555_s3, %s415_s5 }
   0xf   : > { %s193_s23 = scalar_lea.vmem %s552_s0, %s424_s20 }
  0x10   : > { %v420_v3 = vld [vmem:[%s193_s23 + $0x10] sm:$0xff]  ;;  %v419_v6 = vld [vmem:[%s193_s23 + $0x8] sm:$0xff]  ;;  %v418_v7 = vld [vmem:[%s193_s23] sm:$0xff] }
  0x11   : > { %277 = vmatpush.bf16.msra.mxu0 %v420_v3  ;;  %421 = vmatpush.bf16.msra.mxu1 %v420_v3 }
  0x15   : > { %278 = vmatpush.bf16.msra.mxu0 %v419_v6  ;;  %422 = vmatpush.bf16.msra.mxu1 %v419_v6 }
  0x16   : > { %234 = vperm.xlu1 %451, %v216_v4   ;;  %224 = vperm.xlu0 %450, %v214_v5  }
  0x19   : > { %279 = vmatpush.bf16.msra.mxu0 %v418_v7  ;;  %423 = vmatpush.bf16.msra.mxu1 %v418_v7 }
  0x1c   : > { %411 = vmatmul.msk.bf16.vlgmr.msra.gmra.mxu0 %vm265_vm0, %v416_v8  ;;  %412 = vmatmul.msk.bf16.vlgmr.msra.gmra.mxu1 %vm265_vm0, %v417_v9 }
  0x80   : > { %v230_v10 = vpop.permute.xlu1 %229  ;;  %v220_v11 = vpop.permute.xlu0 %219 }
  0x88   : > { %v235_v18 = vpop.permute.xlu1 %234  ;;  %v225_v19 = vpop.permute.xlu0 %224 }
  0x99   : > { %v281_v12 = vpop.f32.mrf.mxu0  ;;  %v286_v13 = vpop.f32.mrf.mxu1 }
  0x9a   : > { %v282_v14 = vadd.f32 %v281_v12, %v220_v11  ;;  %v287_v15 = vadd.f32 %v286_v13, %v230_v10 }
  0x9c   : > { %v291_v16 = vpack.c.bf16 %v282_v14, %v282_v14  ;;  %v293_v17 = vpack.c.bf16 %v287_v15, %v287_v15 }
  0x9e   : > { %296 = vst.msk [vmem:[%s201_s8] sm:$0xf] %vm295_vm1, %v291_v16 }
  0x9f   : > { %298 = vst.msk [vmem:[%s201_s8 + $0x8] sm:$0xf] %vm295_vm1, %v293_v17 }
  0xa1   : > { %v283_v20 = vpop.f32.mrf.mxu0  ;;  %v288_v21 = vpop.f32.mrf.mxu1 }
  0xa2   : > { %v284_v22 = vadd.f32 %v283_v20, %v225_v19  ;;  %v289_v23 = vadd.f32 %v288_v21, %v235_v18 }
  0xa4   : > { %v292_v24 = vpack.c.bf16 %v284_v22, %v284_v22  ;;  %v294_v25 = vpack.c.bf16 %v289_v23, %v289_v23 }
  0xa6   : > { %297 = vst.msk [vmem:[%s201_s8 + $0x4] sm:$0xf] %vm295_vm1, %v292_v24 }
  0xa7   : > { %299 = vst.msk [vmem:[%s201_s8 + $0xc] sm:$0xf] %vm295_vm1, %v294_v25 }
  0xa8 PF: > { %s13_s14 = sadd.s32 1, %s474_s14   ;;  %s556_s12 = smov %s470_s13 }
  0xa9   : > { %p10_p5 = scmp.ge.s32.totalorder %s13_s14, 4   ;;  %s557_s13 = smov %s559_s15 }
  0xab   :  { %12 = sbr.rel (!%p10_p5) target bundleno = 2 (0x2), region = 62 }

</bundles_post_ra>
